<compile_context>
chip_gen: v6e
topology: v6e:2x2x1
jax: 0.10.0
libtpu: 0.0.40
codegen_flags: <defaults>
</compile_context>

<pallas_src>
import jax
import jax.numpy as jnp
from jax.experimental import pallas as pl
from jax.experimental.pallas import tpu as pltpu


def _round_up(v: int, m: int) -> int:
    return (v + m - 1) // m * m


def _cdiv(a: int, b: int) -> int:
    return (a + b - 1) // b


def _row_align(dtype) -> int:
    # Sublane alignment: 8 rows for 32-bit, 16 for bf16, 32 for int8/fp8.
    itemsize = jnp.dtype(dtype).itemsize
    return max(8, 32 // max(itemsize, 1))


def _broadcast_kernel(col_ref, o_ref):
    # col_ref: (tile_rows, 1) per-row velocities; o_ref: (tile_rows, nx).
    # Single lane-broadcast + one aligned whole-tile store.
    o_ref[...] = jnp.broadcast_to(col_ref[...], o_ref.shape)


def layered_model(x: jax.Array, layer_thickness: int, nx: int) -> jax.Array:
    """Pallas equivalent of Model.forward."""
    n_layers = x.shape[0]
    out_rows = n_layers * layer_thickness
    dtype = x.dtype
    elt = jnp.dtype(dtype).itemsize
    align = _row_align(dtype)

    # Per-row velocity column (out_rows elements — a few KB at most).  This is
    # the only "compute"; the kernel just broadcasts it along the lane axis.
    col = jnp.repeat(x, layer_thickness).reshape(out_rows, 1)

    # --- Tile sizing -------------------------------------------------------
    # Target ~8 MiB output tiles: drains in ~2.5 us @ v7x, ~6 us @ v6e,
    # ~10 us @ v5e, so the ~0.35 us fixed per-step overhead is <10% everywhere.
    target_tile_bytes = 8 * 1024 * 1024
    row_bytes = nx * elt
    rows_per_target = max(align, (target_tile_bytes // row_bytes) // align * align)

    if out_rows <= rows_per_target:
        # Single block covering the whole row extent (block dim == full array
        # dim is always a legal block shape; no clipping, no junk rows).
        tile_rows = out_rows
    else:
        tile_rows = rows_per_target

    # v7x megacore: for non-trivial outputs make sure there are >=2 parallel
    # tiles so the grid shards across both TensorCores (no effect on v5e/v6e).
    if out_rows * row_bytes >= 512 * 1024 and _cdiv(out_rows, tile_rows) < 2:
        tile_rows = max(align, _round_up(_cdiv(out_rows, 2), align))

    grid = (_cdiv(out_rows, tile_rows),)

    # Double-buffered output tile + (tiny) column tile, plus 1 MiB headroom.
    tile_bytes = tile_rows * row_bytes
    vmem_needed = 2 * (tile_bytes + tile_rows * elt) + (1 << 20)
    vmem_limit = int(min(48 * 1024 * 1024, max(vmem_needed, 32 * 1024 * 1024)))

    out = pl.pallas_call(
        _broadcast_kernel,
        out_shape=jax.ShapeDtypeStruct((out_rows, nx), dtype),
        grid_spec=pl.GridSpec(
            grid=grid,
            in_specs=[pl.BlockSpec((tile_rows, 1), lambda i: (i, 0))],
            out_specs=pl.BlockSpec((tile_rows, nx), lambda i: (i, 0)),
        ),
        compiler_params=pltpu.CompilerParams(
            dimension_semantics=("parallel",),
            vmem_limit_bytes=vmem_limit,
        ),
        cost_estimate=pl.CostEstimate(
            flops=0,
            transcendentals=0,
            bytes_accessed=out_rows * nx * elt + out_rows * elt,
        ),
    )(col)
    return out


if __name__ == "__main__":
    layer_thickness = 5
    nx = 100

    # Deterministic example input: 4 layer velocities (~1750 m/s, per the spec).
    key = jax.random.PRNGKey(0)
    x = 1750.0 * jnp.ones((4,), dtype=jnp.float32) + jax.random.normal(
        key, (4,), dtype=jnp.float32
    )

    out = layered_model(x, layer_thickness, nx)
    out = jax.block_until_ready(out)

    # Pure-JAX reference of the PyTorch forward.
    ref = jnp.broadcast_to(
        jnp.repeat(x, layer_thickness)[:, None],
        (x.shape[0] * layer_thickness, nx),
    )

    assert out.shape == (x.shape[0] * layer_thickness, nx)
    assert out.dtype == jnp.float32
    assert jnp.array_equal(out, ref)

    print("KERNEL_OK")
</pallas_src>

<mosaic_0001>
module attributes {stable_mosaic.version = 11 : i64} {
  func.func @_broadcast_kernel(%arg0: i32, %arg1: memref<20x1xf32, #tpu.memory_space<vmem>>, %arg2: memref<20x100xf32, #tpu.memory_space<vmem>>) attributes {dimension_semantics = [#tpu.dimension_semantics<parallel>], iteration_bounds = array<i64: 1>, scalar_prefetch = 0 : i64, scratch_operands = 0 : i64, tpu.core_type = #tpu.core_type<tc>, window_params = [{transform_indices = @transform_0, window_bounds = array<i64: 20, 1>}, {transform_indices = @transform_1, window_bounds = array<i64: 20, 100>}]} {
    %c0 = arith.constant 0 : index
    %c0_0 = arith.constant 0 : index
    %0 = vector.load %arg1[%c0, %c0_0] : memref<20x1xf32, #tpu.memory_space<vmem>>, vector<20x1xf32>
    %1 = vector.shape_cast %0 : vector<20x1xf32> to vector<20x1xf32>
    %2 = vector.broadcast %1 : vector<20x1xf32> to vector<20x100xf32>
    %c0_1 = arith.constant 0 : index
    %c0_2 = arith.constant 0 : index
    %3 = vector.load %arg2[%c0_1, %c0_2] : memref<20x100xf32, #tpu.memory_space<vmem>>, vector<20x100xf32>
    tpu.vector_store %arg2[%c0_1, %c0_2], %2 {strides = array<i32>} : memref<20x100xf32, #tpu.memory_space<vmem>>, vector<20x100xf32>,
    return
  }
  func.func @transform_0(%arg0: i32) -> (i32, i32) {
    %c0_i32 = arith.constant 0 : i32
    %c0_i32_0 = arith.constant 0 : i32
    return %arg0, %c0_i32 : i32, i32
  }
  func.func @transform_1(%arg0: i32) -> (i32, i32) {
    %c0_i32 = arith.constant 0 : i32
    %c0_i32_0 = arith.constant 0 : i32
    return %arg0, %c0_i32 : i32, i32
  }
}

</mosaic_0001>

<bundles_post_ra>
// kernel: tpu_custom_call.1
= control target key start
LH: loop header
LB: loop body
LE: loop exit
PB: predicated region body
PF: predicated region fallthrough
CT: control target
= control target key end

     0   :  { %v76_v2 = vmov 0   ;;  %s102_s0 = inlined_call_operand.vmem [shape: f32[20,1], index: 0, kind: input, shape index: {}]   ;;  %s103_s1 = inlined_call_operand.hbm [shape: f32[20,100], index: 1, kind: output, shape index: {}]  }
   0x1   :  { %v9_v0 = vld [vmem:[%s102_s0] sm:$0xff]  ;;  %v11_v1 = vld [vmem:[%s102_s0 + $0x10] sm:$0xf]  ;;  %52 = vset.pattern.permute.xlu0 %v76_v2  ;;  %53 = vset.pattern.permute.xlu1 %v76_v2 }
   0x2   :  { %6 = vsyncpa [#allocation3], 0  ;;  %14 = vperm.xlu0 %52, %v9_v0   ;;  %24 = vperm.xlu1 %53, %v11_v1   ;;  %v10_v3 = vld [vmem:[%s102_s0 + $0x8] sm:$0xff]  ;;  %vm27_vm0 = vcmask 818176   ;;  %vm30_vm1 = vcmask 814080   ;;  %s77_s12 = smov [#allocation2]  }
   0x3   :  { %s37_s13 = sshll.u32 %s77_s12, 4  ;;  %s38_s13 = int_to_ptr.vmem [resolvable:$true] %s37_s13 }
   0x4   :  { %s54_s14 = scalar_lea.vmem %s38_s13, 384  ;;  %p59_p1 = scmp.lt.s32.totalorder %s38_s13, %s38_s13 }
   0x5   :  { %p55_p0 = scmp.ne.s32.totalorder %s38_s13, %s54_s14  ;;  %p60_p2 = scmp.lt.s32.totalorder %s54_s14, %s54_s14 }
   0x6   :  { %19 = vperm.xlu0 %52, %v10_v3  }
   0x7   :  { %p61_p3 = por %p60_p2, %p59_p1 }
   0x9   :  { %p62_p4 = pnand %p61_p3, %p55_p0 }
  0x7d   :  { %v15_v4 = vpop.permute.xlu0 %14  ;;  %v25_v5 = vpop.permute.xlu1 %24 }
  0x7e   :  { %28 = vst.msk [vmem:[#allocation2] sm:$0xff] %vm27_vm0, %v15_v4 }
  0x7f   :  { %31 = vst.msk [vmem:[#allocation2 + $0x10] sm:$0xf] %vm30_vm1, %v25_v5 }
  0x81   :  { %v20_v6 = vpop.permute.xlu0 %19 }
  0x82   :  { %29 = vst.msk [vmem:[#allocation2 + $0x8] sm:$0xff] %vm27_vm0, %v20_v6 }
  0x83   :  { %65 = shalt.err (!%p62_p4)
}
  0x84   :  { %s78_s0 = smov 128   ;;  %s79_s15 = smov 8  }
  0x85   :  { %43 = dma.vmem_to_hbm [thread:$0]  %s38_s13, 384, %s103_s1, [#allocation3], %s78_s0, %s78_s0, %s79_s15  }
  0x86   :  { %74 = dma.done.wait [#allocation3], 384  }
  0x87   :  { %75 = vsyncadd [#allocation3], 4294966912 }
  0x88   :  { %47 = vsyncpa [#allocation3], 1 }

</bundles_post_ra>
